<compile_context>
chip_gen: v7x
topology: tpu7x:2x2x1
jax: 0.10.0
libtpu: 0.0.40
codegen_flags: <defaults>
</compile_context>

<pallas_src>
import functools

import jax
import jax.numpy as jnp
from jax.experimental import pallas as pl
from jax.experimental.pallas import tpu as pltpu


def _make_kernel(S, Bp, H):
    """Build the kernel closure with static S (seq len), Bp (padded batch), H."""

    def kernel(x_ref, wih_ref, whh_ref, b_ref, wl1_ref, bl1_ref, out_ref):
        # ---- prologue: input projection for every time step, one MXU pass ----
        # x_ref is (S*Bp, I) in time-major row order (row = t*Bp + b).
        xg = (jnp.dot(x_ref[...], wih_ref[...],
                      preferred_element_type=jnp.float32)
              + b_ref[...])                                   # (S*Bp, 4H)

        w_hh = whh_ref[...]                                   # (H, 4H), read once

        # ---- fused-gate nonlinearity constants (hoisted out of the loop) ----
        # PyTorch gate order along the 4H lane axis: [i | f | g | o].
        # i/f/o are sigmoids, g is tanh.  Using the exact identity
        #   sigmoid(x) = 0.5 * tanh(0.5 * x) + 0.5
        # all four gates become ONE full-vreg tanh with per-lane affine
        # pre-/post-scaling (VPU work, off the EUP slot).
        lane = jax.lax.broadcasted_iota(jnp.int32, (Bp, 4 * H), 1)
        is_sig = (lane < 2 * H) | (lane >= 3 * H)             # i, f, o lanes
        gate_scale = jnp.where(is_sig, 0.5, 1.0).astype(jnp.float32)
        gate_add = jnp.where(is_sig, 0.5, 0.0).astype(jnp.float32)

        h = jnp.zeros((Bp, H), jnp.float32)
        c = jnp.zeros((Bp, H), jnp.float32)

        # ---- recurrence: only h @ W_hh + gate math on the serial path -------
        for t in range(S):                                    # static unroll
            g = xg[t * Bp:(t + 1) * Bp, :] + jnp.dot(
                h, w_hh, preferred_element_type=jnp.float32)  # (Bp, 4H)
            # Single EUP pass over all 4 gates (128 lanes = one vreg width).
            act = jnp.tanh(g * gate_scale) * gate_scale + gate_add
            i_g = act[:, 0 * H:1 * H]
            f_g = act[:, 1 * H:2 * H]
            g_g = act[:, 2 * H:3 * H]
            o_g = act[:, 3 * H:4 * H]
            c = f_g * c + i_g * g_g
            h = o_g * jnp.tanh(c)
        # Note: the 32-lane gate-result slices above are cheap sub-vreg
        # extracts and (per review) not worth a slice-free layout at H=32.

        # ---- epilogue: hn = tanh(l1(h_T)); dropout(p=0) is the identity ----
        hn = jnp.tanh(jnp.dot(h, wl1_ref[...],
                              preferred_element_type=jnp.float32)
                      + bl1_ref[...])
        out_ref[...] = hn.astype(out_ref.dtype)               # single store

    return kernel


@functools.partial(jax.jit, static_argnames=())
def encoder_rnn_forward(x, w_ih, w_hh, b_gates, w_l1, b_l1):
    """x: (B, S, I) f32; weights pre-transposed: (I,4H), (H,4H), (H,H).
    Returns hn: (1, B, H) f32 (== PyTorch EncoderRNN(x)).

    jit-ed as one executable so the pad/transpose/reshape/slice plumbing and
    the pallas_call fuse into a single dispatch (the kernel itself is only a
    few microseconds)."""
    B, S, I = x.shape
    H = w_hh.shape[0]
    Bp = ((B + 7) // 8) * 8                       # pad batch to sublane height

    # Pad batch, go time-major and flatten: row t*Bp + b holds x[b, t, :].
    x_p = jnp.zeros((Bp, S, I), x.dtype).at[:B].set(x)
    x2d = jnp.transpose(x_p, (1, 0, 2)).reshape(S * Bp, I)

    kernel = _make_kernel(S, Bp, H)

    out = pl.pallas_call(
        kernel,
        out_shape=jax.ShapeDtypeStruct((Bp, H), jnp.float32),
        grid_spec=pltpu.PrefetchScalarGridSpec(
            num_scalar_prefetch=0,
            grid=(1,),                            # single invocation
            in_specs=[
                pl.BlockSpec((S * Bp, I), lambda i: (0, 0)),   # x, flattened
                pl.BlockSpec((I, 4 * H), lambda i: (0, 0)),    # W_ih^T
                pl.BlockSpec((H, 4 * H), lambda i: (0, 0)),    # W_hh^T
                pl.BlockSpec((1, 4 * H), lambda i: (0, 0)),    # b_ih + b_hh
                pl.BlockSpec((H, H), lambda i: (0, 0)),        # l1 weight^T
                pl.BlockSpec((1, H), lambda i: (0, 0)),        # l1 bias
            ],
            out_specs=pl.BlockSpec((Bp, H), lambda i: (0, 0)),
        ),
        compiler_params=pltpu.CompilerParams(
            dimension_semantics=("arbitrary",)),
    )(x2d, w_ih, w_hh, b_gates.reshape(1, 4 * H), w_l1, b_l1.reshape(1, H))

    return out[:B][None, :, :]                    # (1, B, H), drop batch padding


def encoder_rnn_reference(x, w_ih, w_hh, b_gates, w_l1, b_l1):
    """Pure-JAX reference (lax.scan LSTM) for correctness checking."""
    B, S, I = x.shape
    H = w_hh.shape[0]

    def step(carry, x_t):
        h, c = carry
        gates = x_t @ w_ih + h @ w_hh + b_gates
        i = jax.nn.sigmoid(gates[:, 0 * H:1 * H])
        f = jax.nn.sigmoid(gates[:, 1 * H:2 * H])
        g = jnp.tanh(gates[:, 2 * H:3 * H])
        o = jax.nn.sigmoid(gates[:, 3 * H:4 * H])
        c = f * c + i * g
        h = o * jnp.tanh(c)
        return (h, c), None

    h0 = jnp.zeros((B, H), jnp.float32)
    c0 = jnp.zeros((B, H), jnp.float32)
    (hT, _), _ = jax.lax.scan(step, (h0, c0), jnp.transpose(x, (1, 0, 2)))
    return jnp.tanh(hT @ w_l1 + b_l1)[None, :, :]             # (1, B, H)


if __name__ == "__main__":
    # Small shapes consistent with the module's forward (batch_first LSTM).
    B, S, I, H = 2, 8, 16, 32

    key = jax.random.PRNGKey(0)
    kx, k1, k2, k3, k4, k5 = jax.random.split(key, 6)

    x = jax.random.normal(kx, (B, S, I), dtype=jnp.float32)

    # PyTorch stores weight_ih_l0 as (4H, I), weight_hh_l0 as (4H, H) and
    # l1.weight as (H, H); we keep the transposed layouts so the kernel does
    # plain row-major matmuls.  Biases are nonzero here to exercise the
    # broadcast path (the module merely *initialises* them to 0).
    w_ih = 0.1 * jax.random.normal(k1, (I, 4 * H), dtype=jnp.float32)
    w_hh = 0.1 * jax.random.normal(k2, (H, 4 * H), dtype=jnp.float32)
    b_gates = 0.1 * jax.random.normal(k3, (4 * H,), dtype=jnp.float32)  # b_ih+b_hh
    w_l1 = 0.1 * jax.random.normal(k4, (H, H), dtype=jnp.float32)
    b_l1 = 0.1 * jax.random.normal(k5, (H,), dtype=jnp.float32)
    # TODO(synk): PyTorch uses orthogonal init for the LSTM weights; plain
    # Gaussian init is used here since only the forward computation matters.

    hn = encoder_rnn_forward(x, w_ih, w_hh, b_gates, w_l1, b_l1)
    hn = jax.block_until_ready(hn)

    ref = encoder_rnn_reference(x, w_ih, w_hh, b_gates, w_l1, b_l1)
    assert hn.shape == (1, B, H), hn.shape
    err = float(jnp.max(jnp.abs(hn - ref)))
    assert jnp.allclose(hn, ref, atol=2e-5, rtol=2e-5), (
        f"mismatch vs reference: max abs err {err}")

    print("KERNEL_OK")
</pallas_src>

<mosaic_0001>
module attributes {stable_mosaic.version = 11 : i64} {
  func.func @kernel(%arg0: i32, %arg1: memref<64x16xf32, #tpu.memory_space<vmem>>, %arg2: memref<16x128xf32, #tpu.memory_space<vmem>>, %arg3: memref<32x128xf32, #tpu.memory_space<vmem>>, %arg4: memref<1x128xf32, #tpu.memory_space<vmem>>, %arg5: memref<32x32xf32, #tpu.memory_space<vmem>>, %arg6: memref<1x32xf32, #tpu.memory_space<vmem>>, %arg7: memref<8x32xf32, #tpu.memory_space<vmem>>) attributes {dimension_semantics = [#tpu.dimension_semantics<arbitrary>], iteration_bounds = array<i64: 1>, scalar_prefetch = 0 : i64, scratch_operands = 0 : i64, tpu.core_type = #tpu.core_type<tc>, window_params = [{pipeline_mode = #tpu.pipeline_mode<synchronous>, transform_indices = @transform_0, window_bounds = array<i64: 64, 16>}, {pipeline_mode = #tpu.pipeline_mode<synchronous>, transform_indices = @transform_1, window_bounds = array<i64: 16, 128>}, {pipeline_mode = #tpu.pipeline_mode<synchronous>, transform_indices = @transform_2, window_bounds = array<i64: 32, 128>}, {pipeline_mode = #tpu.pipeline_mode<synchronous>, transform_indices = @transform_3, window_bounds = array<i64: 1, 128>}, {pipeline_mode = #tpu.pipeline_mode<synchronous>, transform_indices = @transform_4, window_bounds = array<i64: 32, 32>}, {pipeline_mode = #tpu.pipeline_mode<synchronous>, transform_indices = @transform_5, window_bounds = array<i64: 1, 32>}, {pipeline_mode = #tpu.pipeline_mode<synchronous>, transform_indices = @transform_6, window_bounds = array<i64: 8, 32>}]} {
    %c0 = arith.constant 0 : index
    %c0_0 = arith.constant 0 : index
    %0 = vector.load %arg1[%c0, %c0_0] : memref<64x16xf32, #tpu.memory_space<vmem>>, vector<64x16xf32>
    %c0_1 = arith.constant 0 : index
    %c0_2 = arith.constant 0 : index
    %1 = vector.load %arg2[%c0_1, %c0_2] : memref<16x128xf32, #tpu.memory_space<vmem>>, vector<16x128xf32>
    %cst = arith.constant dense<0.000000e+00> : vector<64x128xf32>
    %2 = tpu.matmul %0, %1, %cst {dimension_numbers = #tpu.dot_dimension_numbers<[1], [0], [0], [1], [0, 0, 1, 1], [], []>} : vector<64x16xf32>, vector<16x128xf32>, vector<64x128xf32> -> vector<64x128xf32>
    %c0_3 = arith.constant 0 : index
    %c0_4 = arith.constant 0 : index
    %3 = vector.load %arg4[%c0_3, %c0_4] : memref<1x128xf32, #tpu.memory_space<vmem>>, vector<1x128xf32>
    %4 = vector.broadcast %3 : vector<1x128xf32> to vector<64x128xf32>
    %5 = arith.addf %2, %4 : vector<64x128xf32>
    %c0_5 = arith.constant 0 : index
    %c0_6 = arith.constant 0 : index
    %6 = vector.load %arg3[%c0_5, %c0_6] : memref<32x128xf32, #tpu.memory_space<vmem>>, vector<32x128xf32>
    %7 = tpu.iota {dimensions = array<i32: 1>} : vector<8x128xi32>
    %c64_i32 = arith.constant 64 : i32
    %8 = vector.broadcast %c64_i32 : i32 to vector<8x128xi32>
    %9 = arith.cmpi slt, %7, %8 : vector<8x128xi32>
    %c96_i32 = arith.constant 96 : i32
    %10 = vector.broadcast %c96_i32 : i32 to vector<8x128xi32>
    %11 = arith.cmpi sge, %7, %10 : vector<8x128xi32>
    %12 = arith.ori %9, %11 : vector<8x128xi1>
    %cst_7 = arith.constant 5.000000e-01 : f32
    %cst_8 = arith.constant 1.000000e+00 : f32
    %13 = vector.broadcast %cst_7 : f32 to vector<8x128xf32>
    %14 = vector.broadcast %cst_8 : f32 to vector<8x128xf32>
    %15 = arith.select %12, %13, %14 : vector<8x128xi1>, vector<8x128xf32>
    %cst_9 = arith.constant 5.000000e-01 : f32
    %cst_10 = arith.constant 0.000000e+00 : f32
    %16 = vector.broadcast %cst_9 : f32 to vector<8x128xf32>
    %17 = vector.broadcast %cst_10 : f32 to vector<8x128xf32>
    %18 = arith.select %12, %16, %17 : vector<8x128xi1>, vector<8x128xf32>
    %cst_11 = arith.constant 0.000000e+00 : f32
    %19 = vector.broadcast %cst_11 : f32 to vector<8x32xf32>
    %cst_12 = arith.constant 0.000000e+00 : f32
    %20 = vector.broadcast %cst_12 : f32 to vector<8x32xf32>
    %21 = vector.extract_strided_slice %5 {offsets = [0, 0], sizes = [8, 128], strides = [1, 1]} : vector<64x128xf32> to vector<8x128xf32>
    %cst_13 = arith.constant dense<0.000000e+00> : vector<8x128xf32>
    %22 = tpu.matmul %19, %6, %cst_13 {dimension_numbers = #tpu.dot_dimension_numbers<[1], [0], [0], [1], [0, 0, 1, 1], [], []>} : vector<8x32xf32>, vector<32x128xf32>, vector<8x128xf32> -> vector<8x128xf32>
    %23 = arith.addf %21, %22 : vector<8x128xf32>
    %24 = arith.mulf %23, %15 : vector<8x128xf32>
    %25 = math.tanh %24 : vector<8x128xf32>
    %26 = arith.mulf %25, %15 : vector<8x128xf32>
    %27 = arith.addf %26, %18 : vector<8x128xf32>
    %28 = vector.extract_strided_slice %27 {offsets = [0, 0], sizes = [8, 32], strides = [1, 1]} : vector<8x128xf32> to vector<8x32xf32>
    %29 = vector.extract_strided_slice %27 {offsets = [0, 32], sizes = [8, 32], strides = [1, 1]} : vector<8x128xf32> to vector<8x32xf32>
    %30 = vector.extract_strided_slice %27 {offsets = [0, 64], sizes = [8, 32], strides = [1, 1]} : vector<8x128xf32> to vector<8x32xf32>
    %31 = vector.extract_strided_slice %27 {offsets = [0, 96], sizes = [8, 32], strides = [1, 1]} : vector<8x128xf32> to vector<8x32xf32>
    %32 = arith.mulf %29, %20 : vector<8x32xf32>
    %33 = arith.mulf %28, %30 : vector<8x32xf32>
    %34 = arith.addf %32, %33 : vector<8x32xf32>
    %35 = math.tanh %34 : vector<8x32xf32>
    %36 = arith.mulf %31, %35 : vector<8x32xf32>
    %37 = vector.extract_strided_slice %5 {offsets = [8, 0], sizes = [8, 128], strides = [1, 1]} : vector<64x128xf32> to vector<8x128xf32>
    %cst_14 = arith.constant dense<0.000000e+00> : vector<8x128xf32>
    %38 = tpu.matmul %36, %6, %cst_14 {dimension_numbers = #tpu.dot_dimension_numbers<[1], [0], [0], [1], [0, 0, 1, 1], [], []>} : vector<8x32xf32>, vector<32x128xf32>, vector<8x128xf32> -> vector<8x128xf32>
    %39 = arith.addf %37, %38 : vector<8x128xf32>
    %40 = arith.mulf %39, %15 : vector<8x128xf32>
    %41 = math.tanh %40 : vector<8x128xf32>
    %42 = arith.mulf %41, %15 : vector<8x128xf32>
    %43 = arith.addf %42, %18 : vector<8x128xf32>
    %44 = vector.extract_strided_slice %43 {offsets = [0, 0], sizes = [8, 32], strides = [1, 1]} : vector<8x128xf32> to vector<8x32xf32>
    %45 = vector.extract_strided_slice %43 {offsets = [0, 32], sizes = [8, 32], strides = [1, 1]} : vector<8x128xf32> to vector<8x32xf32>
    %46 = vector.extract_strided_slice %43 {offsets = [0, 64], sizes = [8, 32], strides = [1, 1]} : vector<8x128xf32> to vector<8x32xf32>
    %47 = vector.extract_strided_slice %43 {offsets = [0, 96], sizes = [8, 32], strides = [1, 1]} : vector<8x128xf32> to vector<8x32xf32>
    %48 = arith.mulf %45, %34 : vector<8x32xf32>
    %49 = arith.mulf %44, %46 : vector<8x32xf32>
    %50 = arith.addf %48, %49 : vector<8x32xf32>
    %51 = math.tanh %50 : vector<8x32xf32>
    %52 = arith.mulf %47, %51 : vector<8x32xf32>
    %53 = vector.extract_strided_slice %5 {offsets = [16, 0], sizes = [8, 128], strides = [1, 1]} : vector<64x128xf32> to vector<8x128xf32>
    %cst_15 = arith.constant dense<0.000000e+00> : vector<8x128xf32>
    %54 = tpu.matmul %52, %6, %cst_15 {dimension_numbers = #tpu.dot_dimension_numbers<[1], [0], [0], [1], [0, 0, 1, 1], [], []>} : vector<8x32xf32>, vector<32x128xf32>, vector<8x128xf32> -> vector<8x128xf32>
    %55 = arith.addf %53, %54 : vector<8x128xf32>
    %56 = arith.mulf %55, %15 : vector<8x128xf32>
    %57 = math.tanh %56 : vector<8x128xf32>
    %58 = arith.mulf %57, %15 : vector<8x128xf32>
    %59 = arith.addf %58, %18 : vector<8x128xf32>
    %60 = vector.extract_strided_slice %59 {offsets = [0, 0], sizes = [8, 32], strides = [1, 1]} : vector<8x128xf32> to vector<8x32xf32>
    %61 = vector.extract_strided_slice %59 {offsets = [0, 32], sizes = [8, 32], strides = [1, 1]} : vector<8x128xf32> to vector<8x32xf32>
    %62 = vector.extract_strided_slice %59 {offsets = [0, 64], sizes = [8, 32], strides = [1, 1]} : vector<8x128xf32> to vector<8x32xf32>
    %63 = vector.extract_strided_slice %59 {offsets = [0, 96], sizes = [8, 32], strides = [1, 1]} : vector<8x128xf32> to vector<8x32xf32>
    %64 = arith.mulf %61, %50 : vector<8x32xf32>
    %65 = arith.mulf %60, %62 : vector<8x32xf32>
    %66 = arith.addf %64, %65 : vector<8x32xf32>
    %67 = math.tanh %66 : vector<8x32xf32>
    %68 = arith.mulf %63, %67 : vector<8x32xf32>
    %69 = vector.extract_strided_slice %5 {offsets = [24, 0], sizes = [8, 128], strides = [1, 1]} : vector<64x128xf32> to vector<8x128xf32>
    %cst_16 = arith.constant dense<0.000000e+00> : vector<8x128xf32>
    %70 = tpu.matmul %68, %6, %cst_16 {dimension_numbers = #tpu.dot_dimension_numbers<[1], [0], [0], [1], [0, 0, 1, 1], [], []>} : vector<8x32xf32>, vector<32x128xf32>, vector<8x128xf32> -> vector<8x128xf32>
    %71 = arith.addf %69, %70 : vector<8x128xf32>
    %72 = arith.mulf %71, %15 : vector<8x128xf32>
    %73 = math.tanh %72 : vector<8x128xf32>
    %74 = arith.mulf %73, %15 : vector<8x128xf32>
    %75 = arith.addf %74, %18 : vector<8x128xf32>
    %76 = vector.extract_strided_slice %75 {offsets = [0, 0], sizes = [8, 32], strides = [1, 1]} : vector<8x128xf32> to vector<8x32xf32>
    %77 = vector.extract_strided_slice %75 {offsets = [0, 32], sizes = [8, 32], strides = [1, 1]} : vector<8x128xf32> to vector<8x32xf32>
    %78 = vector.extract_strided_slice %75 {offsets = [0, 64], sizes = [8, 32], strides = [1, 1]} : vector<8x128xf32> to vector<8x32xf32>
    %79 = vector.extract_strided_slice %75 {offsets = [0, 96], sizes = [8, 32], strides = [1, 1]} : vector<8x128xf32> to vector<8x32xf32>
    %80 = arith.mulf %77, %66 : vector<8x32xf32>
    %81 = arith.mulf %76, %78 : vector<8x32xf32>
    %82 = arith.addf %80, %81 : vector<8x32xf32>
    %83 = math.tanh %82 : vector<8x32xf32>
    %84 = arith.mulf %79, %83 : vector<8x32xf32>
    %85 = vector.extract_strided_slice %5 {offsets = [32, 0], sizes = [8, 128], strides = [1, 1]} : vector<64x128xf32> to vector<8x128xf32>
    %cst_17 = arith.constant dense<0.000000e+00> : vector<8x128xf32>
    %86 = tpu.matmul %84, %6, %cst_17 {dimension_numbers = #tpu.dot_dimension_numbers<[1], [0], [0], [1], [0, 0, 1, 1], [], []>} : vector<8x32xf32>, vector<32x128xf32>, vector<8x128xf32> -> vector<8x128xf32>
    %87 = arith.addf %85, %86 : vector<8x128xf32>
    %88 = arith.mulf %87, %15 : vector<8x128xf32>
    %89 = math.tanh %88 : vector<8x128xf32>
    %90 = arith.mulf %89, %15 : vector<8x128xf32>
    %91 = arith.addf %90, %18 : vector<8x128xf32>
    %92 = vector.extract_strided_slice %91 {offsets = [0, 0], sizes = [8, 32], strides = [1, 1]} : vector<8x128xf32> to vector<8x32xf32>
    %93 = vector.extract_strided_slice %91 {offsets = [0, 32], sizes = [8, 32], strides = [1, 1]} : vector<8x128xf32> to vector<8x32xf32>
    %94 = vector.extract_strided_slice %91 {offsets = [0, 64], sizes = [8, 32], strides = [1, 1]} : vector<8x128xf32> to vector<8x32xf32>
    %95 = vector.extract_strided_slice %91 {offsets = [0, 96], sizes = [8, 32], strides = [1, 1]} : vector<8x128xf32> to vector<8x32xf32>
    %96 = arith.mulf %93, %82 : vector<8x32xf32>
    %97 = arith.mulf %92, %94 : vector<8x32xf32>
    %98 = arith.addf %96, %97 : vector<8x32xf32>
    %99 = math.tanh %98 : vector<8x32xf32>
    %100 = arith.mulf %95, %99 : vector<8x32xf32>
    %101 = vector.extract_strided_slice %5 {offsets = [40, 0], sizes = [8, 128], strides = [1, 1]} : vector<64x128xf32> to vector<8x128xf32>
    %cst_18 = arith.constant dense<0.000000e+00> : vector<8x128xf32>
    %102 = tpu.matmul %100, %6, %cst_18 {dimension_numbers = #tpu.dot_dimension_numbers<[1], [0], [0], [1], [0, 0, 1, 1], [], []>} : vector<8x32xf32>, vector<32x128xf32>, vector<8x128xf32> -> vector<8x128xf32>
    %103 = arith.addf %101, %102 : vector<8x128xf32>
    %104 = arith.mulf %103, %15 : vector<8x128xf32>
    %105 = math.tanh %104 : vector<8x128xf32>
    %106 = arith.mulf %105, %15 : vector<8x128xf32>
    %107 = arith.addf %106, %18 : vector<8x128xf32>
    %108 = vector.extract_strided_slice %107 {offsets = [0, 0], sizes = [8, 32], strides = [1, 1]} : vector<8x128xf32> to vector<8x32xf32>
    %109 = vector.extract_strided_slice %107 {offsets = [0, 32], sizes = [8, 32], strides = [1, 1]} : vector<8x128xf32> to vector<8x32xf32>
    %110 = vector.extract_strided_slice %107 {offsets = [0, 64], sizes = [8, 32], strides = [1, 1]} : vector<8x128xf32> to vector<8x32xf32>
    %111 = vector.extract_strided_slice %107 {offsets = [0, 96], sizes = [8, 32], strides = [1, 1]} : vector<8x128xf32> to vector<8x32xf32>
    %112 = arith.mulf %109, %98 : vector<8x32xf32>
    %113 = arith.mulf %108, %110 : vector<8x32xf32>
    %114 = arith.addf %112, %113 : vector<8x32xf32>
    %115 = math.tanh %114 : vector<8x32xf32>
    %116 = arith.mulf %111, %115 : vector<8x32xf32>
    %117 = vector.extract_strided_slice %5 {offsets = [48, 0], sizes = [8, 128], strides = [1, 1]} : vector<64x128xf32> to vector<8x128xf32>
    %cst_19 = arith.constant dense<0.000000e+00> : vector<8x128xf32>
    %118 = tpu.matmul %116, %6, %cst_19 {dimension_numbers = #tpu.dot_dimension_numbers<[1], [0], [0], [1], [0, 0, 1, 1], [], []>} : vector<8x32xf32>, vector<32x128xf32>, vector<8x128xf32> -> vector<8x128xf32>
    %119 = arith.addf %117, %118 : vector<8x128xf32>
    %120 = arith.mulf %119, %15 : vector<8x128xf32>
    %121 = math.tanh %120 : vector<8x128xf32>
    %122 = arith.mulf %121, %15 : vector<8x128xf32>
    %123 = arith.addf %122, %18 : vector<8x128xf32>
    %124 = vector.extract_strided_slice %123 {offsets = [0, 0], sizes = [8, 32], strides = [1, 1]} : vector<8x128xf32> to vector<8x32xf32>
    %125 = vector.extract_strided_slice %123 {offsets = [0, 32], sizes = [8, 32], strides = [1, 1]} : vector<8x128xf32> to vector<8x32xf32>
    %126 = vector.extract_strided_slice %123 {offsets = [0, 64], sizes = [8, 32], strides = [1, 1]} : vector<8x128xf32> to vector<8x32xf32>
    %127 = vector.extract_strided_slice %123 {offsets = [0, 96], sizes = [8, 32], strides = [1, 1]} : vector<8x128xf32> to vector<8x32xf32>
    %128 = arith.mulf %125, %114 : vector<8x32xf32>
    %129 = arith.mulf %124, %126 : vector<8x32xf32>
    %130 = arith.addf %128, %129 : vector<8x32xf32>
    %131 = math.tanh %130 : vector<8x32xf32>
    %132 = arith.mulf %127, %131 : vector<8x32xf32>
    %133 = vector.extract_strided_slice %5 {offsets = [56, 0], sizes = [8, 128], strides = [1, 1]} : vector<64x128xf32> to vector<8x128xf32>
    %cst_20 = arith.constant dense<0.000000e+00> : vector<8x128xf32>
    %134 = tpu.matmul %132, %6, %cst_20 {dimension_numbers = #tpu.dot_dimension_numbers<[1], [0], [0], [1], [0, 0, 1, 1], [], []>} : vector<8x32xf32>, vector<32x128xf32>, vector<8x128xf32> -> vector<8x128xf32>
    %135 = arith.addf %133, %134 : vector<8x128xf32>
    %136 = arith.mulf %135, %15 : vector<8x128xf32>
    %137 = math.tanh %136 : vector<8x128xf32>
    %138 = arith.mulf %137, %15 : vector<8x128xf32>
    %139 = arith.addf %138, %18 : vector<8x128xf32>
    %140 = vector.extract_strided_slice %139 {offsets = [0, 0], sizes = [8, 32], strides = [1, 1]} : vector<8x128xf32> to vector<8x32xf32>
    %141 = vector.extract_strided_slice %139 {offsets = [0, 32], sizes = [8, 32], strides = [1, 1]} : vector<8x128xf32> to vector<8x32xf32>
    %142 = vector.extract_strided_slice %139 {offsets = [0, 64], sizes = [8, 32], strides = [1, 1]} : vector<8x128xf32> to vector<8x32xf32>
    %143 = vector.extract_strided_slice %139 {offsets = [0, 96], sizes = [8, 32], strides = [1, 1]} : vector<8x128xf32> to vector<8x32xf32>
    %144 = arith.mulf %141, %130 : vector<8x32xf32>
    %145 = arith.mulf %140, %142 : vector<8x32xf32>
    %146 = arith.addf %144, %145 : vector<8x32xf32>
    %147 = math.tanh %146 : vector<8x32xf32>
    %148 = arith.mulf %143, %147 : vector<8x32xf32>
    %c0_21 = arith.constant 0 : index
    %c0_22 = arith.constant 0 : index
    %149 = vector.load %arg5[%c0_21, %c0_22] : memref<32x32xf32, #tpu.memory_space<vmem>>, vector<32x32xf32>
    %cst_23 = arith.constant dense<0.000000e+00> : vector<8x32xf32>
    %150 = tpu.matmul %148, %149, %cst_23 {dimension_numbers = #tpu.dot_dimension_numbers<[1], [0], [0], [1], [0, 0, 1, 1], [], []>} : vector<8x32xf32>, vector<32x32xf32>, vector<8x32xf32> -> vector<8x32xf32>
    %c0_24 = arith.constant 0 : index
    %c0_25 = arith.constant 0 : index
    %151 = vector.load %arg6[%c0_24, %c0_25] : memref<1x32xf32, #tpu.memory_space<vmem>>, vector<1x32xf32>
    %152 = vector.broadcast %151 : vector<1x32xf32> to vector<8x32xf32>
    %153 = arith.addf %150, %152 : vector<8x32xf32>
    %154 = math.tanh %153 : vector<8x32xf32>
    %c0_26 = arith.constant 0 : index
    %c0_27 = arith.constant 0 : index
    %155 = vector.load %arg7[%c0_26, %c0_27] : memref<8x32xf32, #tpu.memory_space<vmem>>, vector<8x32xf32>
    tpu.vector_store %arg7[%c0_26, %c0_27], %154 {strides = array<i32>} : memref<8x32xf32, #tpu.memory_space<vmem>>, vector<8x32xf32>,
    return
  }
  func.func @transform_0(%arg0: i32) -> (i32, i32) {
    %c0_i32 = arith.constant 0 : i32
    %c0_i32_0 = arith.constant 0 : i32
    %c0_i32_1 = arith.constant 0 : i32
    return %c0_i32, %c0_i32_0 : i32, i32
  }
  func.func @transform_1(%arg0: i32) -> (i32, i32) {
    %c0_i32 = arith.constant 0 : i32
    %c0_i32_0 = arith.constant 0 : i32
    %c0_i32_1 = arith.constant 0 : i32
    return %c0_i32, %c0_i32_0 : i32, i32
  }
  func.func @transform_2(%arg0: i32) -> (i32, i32) {
    %c0_i32 = arith.constant 0 : i32
    %c0_i32_0 = arith.constant 0 : i32
    %c0_i32_1 = arith.constant 0 : i32
    return %c0_i32, %c0_i32_0 : i32, i32
  }
  func.func @transform_3(%arg0: i32) -> (i32, i32) {
    %c0_i32 = arith.constant 0 : i32
    %c0_i32_0 = arith.constant 0 : i32
    %c0_i32_1 = arith.constant 0 : i32
    return %c0_i32, %c0_i32_0 : i32, i32
  }
  func.func @transform_4(%arg0: i32) -> (i32, i32) {
    %c0_i32 = arith.constant 0 : i32
    %c0_i32_0 = arith.constant 0 : i32
    %c0_i32_1 = arith.constant 0 : i32
    return %c0_i32, %c0_i32_0 : i32, i32
  }
  func.func @transform_5(%arg0: i32) -> (i32, i32) {
    %c0_i32 = arith.constant 0 : i32
    %c0_i32_0 = arith.constant 0 : i32
    %c0_i32_1 = arith.constant 0 : i32
    return %c0_i32, %c0_i32_0 : i32, i32
  }
  func.func @transform_6(%arg0: i32) -> (i32, i32) {
    %c0_i32 = arith.constant 0 : i32
    %c0_i32_0 = arith.constant 0 : i32
    %c0_i32_1 = arith.constant 0 : i32
    return %c0_i32, %c0_i32_0 : i32, i32
  }
}

</mosaic_0001>

<bundles_post_ra>
// kernel: encoder_rnn_forward.1
= control target key start
LH: loop header
LB: loop body
LE: loop exit
PB: predicated region body
PF: predicated region fallthrough
CT: control target
= control target key end

     0   :  { %vm40_vm0 = vcmask 130048   ;;  %v1334_v0 = vmov 0.0|0.0   ;;  %vm1335_vm1 = vmmov 0   ;;  %v1336_v4 = vmov 0.0   ;;  %s1339_s13 = smov 32   ;;  %s1595_s1 = inlined_call_operand.vmem [shape: f32[16,128], index: 1, kind: input, shape index: {}]   ;;  %s1596_s2 = inlined_call_operand.vmem [shape: f32[32,128], index: 2, kind: input, shape index: {}]   ;;  %s1597_s0 = inlined_call_operand.vmem [shape: f32[64,16], index: 0, kind: input, shape index: {}]   ;;  %s1598_s3 = inlined_call_operand.vmem [shape: f32[1,128], index: 3, kind: input, shape index: {}]   ;;  %s1599_s4 = inlined_call_operand.vmem [shape: f32[32,32], index: 4, kind: input, shape index: {}]   ;;  %s1600_s5 = inlined_call_operand.vmem [shape: f32[1,32], index: 5, kind: input, shape index: {}]   ;;  %s1601_s6 = inlined_call_operand.vmem [shape: f32[8,32], index: 6, kind: output, shape index: {}]  }
   0x1   :  { %1240 = vmatprep.subr.bf16.mxu1 %v1334_v0  ;;  %v31_v1 = vld [vmem:[%s1595_s1] sm:$0xff]  ;;  %v32_v2 = vld [vmem:[%s1595_s1 + $0x8] sm:$0xff]  ;;  %1145 = vmatprep.mubr.msk.f32.mxu1 %vm1335_vm1, %v1336_v4  ;;  %v172_v9 = vld [vmem:[%s1596_s2 + $0x10] sm:$0xff]  ;;  %v174_v13 = vlaneseq  ;;  %v1337_v19 = vmov 1.0   ;;  %vm181_vm5 = vcmask 261120  }
   0x2   :  { %v170_v3 = vld [vmem:[%s1596_s2] sm:$0xff]  ;;  %v1236_v5 = vpack.c.bf16 %v32_v2, %v31_v1  ;;  %v171_v6 = vld [vmem:[%s1596_s2 + $0x8] sm:$0xff]  ;;  %v173_v10 = vld [vmem:[%s1596_s2 + $0x18] sm:$0xff] }
   0x3   :  { %v23_v7 = vld [vmem:[%s1597_s0] sm:$0xff]  ;;  %v1393_v8 = vpack.c.bf16 %v171_v6, %v170_v3  ;;  %v24_v11 = vld [vmem:[%s1597_s0 + $0x8] sm:$0xff]  ;;  %v1406_v12 = vpack.c.bf16 %v173_v10, %v172_v9  ;;  %v175_v14 = vand.u32 127, %v174_v13  ;;  %v25_v51 = vld [vmem:[%s1597_s0 + $0x10] sm:$0xff] }
   0x4   :  { %1125 = vmatprep.mubr.msk.f32.mxu0 %vm40_vm0, %v23_v7  ;;  %1237 = vmatprep.subr.bf16.mxu0 %v1236_v5  ;;  %v1427_v15 = vld [vmem:[%s1598_s3] ss:$0 sm:$0xff]  ;;  %s1338_s3 = smov 64   ;;  %v26_v52 = vld [vmem:[%s1597_s0 + $0x18] sm:$0xff]  ;;  %v28_v54 = vld [vmem:[%s1597_s0 + $0x28] sm:$0xff] }
   0x5   :  { %1242 = vmatpush3.bf16.msra.mxu1 %v1393_v8  ;;  %1239 = vmatpush3.bf16.msra.mxu0 %v1236_v5  ;;  %vm176_vm2 = vcmp.lt.s32.totalorder %v175_v14, 64  ;;  %vm177_vm3 = vcmp.ge.s32.totalorder %v175_v14, 96  ;;  %v27_v53 = vld [vmem:[%s1597_s0 + $0x20] sm:$0xff]  ;;  %v29_v55 = vld [vmem:[%s1597_s0 + $0x30] sm:$0xff]  ;;  %v30_v56 = vld [vmem:[%s1597_s0 + $0x38] sm:$0xff] }
   0x6   :  { %1243 = vmatprep.subr.bf16.mxu1 %v1334_v0  ;;  %1252 = vmatprep.subr.bf16.mxu0 %v1334_v0  ;;  %vm178_vm4 = vmor %vm176_vm2, %vm177_vm3 }
   0x7   :  { %v1430_v20 = vsel %vm178_vm4, 0.5, %v1337_v19  ;;  %v1434_v26 = vsel %vm178_vm4, 0.5, %v1336_v4 }
   0x8   :  { %1126 = vmatmul.mubr.msk.f32.vlgmr.msra.gmra.mrb[0].mxu0 %vm40_vm0, %v24_v11 }
   0x9   :  { %1245 = vmatpush3.bf16.msra.mxu1 %v1406_v12  ;;  %1254 = vmatpush3.bf16.msra.mxu0 %v1393_v8 }
   0xa   :  { %1246 = vmatprep.subr.bf16.mxu1 %v1334_v0  ;;  %1255 = vmatprep.subr.bf16.mxu0 %v1334_v0 }
   0xb   :  { %1128 = vmatprep.mubr.msk.f32.mxu0 %vm40_vm0, %v25_v51 }
   0xc   :  { %1146 = vmatmul.mubr.f32.vlgmr.msra.gmra.mrb[0].mxu1 %v1336_v4  ;;  %1129 = vmatmul.mubr.msk.f32.gmra.mrb[2].mxu0 %vm40_vm0, %v26_v52 }
   0xd   :  { %1248 = vmatpush3.bf16.msra.mxu1 %v1393_v8  ;;  %1156 = vmatprep.mubr.msk.f32.mxu1 %vm1335_vm1, %v1336_v4 }
   0xe   :  { %1249 = vmatprep.subr.bf16.mxu1 %v1334_v0  ;;  %1257 = vmatpush3.bf16.msra.mxu0 %v1406_v12 }
   0xf   :  { %1264 = vmatprep.subr.bf16.mxu0 %v1334_v0  ;;  %1131 = vmatprep.mubr.msk.f32.mxu0 %vm40_vm0, %v27_v53 }
  0x10   :  { %1132 = vmatmul.mubr.msk.f32.gmra.mrb[4].mxu0 %vm40_vm0, %v28_v54 }
  0x11   :  { %1251 = vmatpush3.bf16.msra.mxu1 %v1406_v12  ;;  %1134 = vmatprep.mubr.msk.f32.mxu0 %vm40_vm0, %v29_v55 }
  0x12   :  { %1258 = vmatprep.subr.bf16.mxu1 %v1334_v0 }
  0x14   :  { %1135 = vmatmul.mubr.msk.f32.gmra.mrb[6].mxu0 %vm40_vm0, %v30_v56 }
  0x15   :  { %1167 = vmatprep.mubr.msk.f32.mxu0 %vm1335_vm1, %v1336_v4 }
  0xdb   :  { %v1127_v16 = vpop.f32.mrb[0].mxu0 }
  0xdc   :  { %v131_v17 = vpop.f32.mrb[1].mxu0  ;;  %v137_v38 = vadd.f32 %v1127_v16, %v1427_v15 }
  0xdd   :  { %v132_v18 = vadd.f32 %v1427_v15, %v131_v17 }
  0xdf   :  { %v251_v21 = vpop.f32.mrb[0].mxu1  ;;  %v1130_v60 = vpop.f32.mrb[2].mxu0 }
  0xe0   :  { %v255_v22 = vadd.f32 %v251_v21, %v132_v18  ;;  %v1147_v23 = vpop.f32.mrb[1].mxu1  ;;  %v141_v61 = vpop.f32.mrb[3].mxu0 }
  0xe1   :  { %v142_v5 = vadd.f32 %v1427_v15, %v141_v61 }
  0xe2   :  { %v256_v24 = vmul.f32 %v255_v22, %v1430_v20 }
  0xe3   :  { %v1483_v62 = vpop.f32.mrb[4].mxu0 }
  0xe4   :  { %1300 = vtanh.f32 %v256_v24  ;;  %v1485_v63 = vpop.f32.mrb[5].mxu0  ;;  %v157_v61 = vadd.f32 %v1483_v62, %v1427_v15 }
  0xe7   :  { %v1487_v1 = vpop.f32.mrb[6].mxu0 }
  0xe8   :  { %v1489_v2 = vpop.f32.mrb[7].mxu0 }
  0xee   :  { %v1301_v25 = vpop.eup %1300 }
  0xef   :  { %v258_v27 = vmul.f32 %v1301_v25, %v1430_v20 }
  0xf1   :  { %v259_v28 = vadd.f32 %v258_v27, %v1434_v26  ;;  %v147_v27 = vadd.f32 %v1130_v60, %v1427_v15 }
  0xf3   :  { %262 = vrot.lane.b32.xlu0 %v259_v28, %s1338_s3  ;;  %v260_v31 = vmul.f32 0.0, %v259_v28 }
 0x165   :  { %v263_v29 = vpop.permute.xlu0 %262 }
 0x166   :  { %v265_v30 = vmul.f32 %v263_v29, %v259_v28 }
 0x168   :  { %267 = vrot.lane.b32.xlu0 %v265_v30, %s1339_s13 }
 0x1da   :  { %v268_v32 = vpop.permute.xlu0 %267 }
 0x1db   :  { %v270_v33 = vadd.f32 %v268_v32, %v260_v31 }
 0x1dd   :  { %1302 = vtanh.f32 %v270_v33 }
 0x1e7   :  { %v1303_v34 = vpop.eup %1302 }
 0x1e8   :  { %273 = vrot.lane.b32.xlu1 %v1303_v34, %s1338_s3 }
 0x25a   :  { %v274_v35 = vpop.permute.xlu1 %273 }
 0x25b   :  { %v276_v36 = vmul.f32 %v274_v35, %v259_v28 }
 0x25d   :  { %278 = vrot.lane.b32.xlu1 %v276_v36, %s1339_s13 }
 0x2cf   :  { %v279_v37 = vpop.permute.xlu1 %278 }
 0x2d0   :  { %1157 = vmatmul.mubr.msk.f32.vlgmr.msra.gmra.mrb[2].mxu1 %vm181_vm5, %v279_v37 }
 0x2d1   :  { %1260 = vmatpush3.bf16.msra.mxu1 %v1393_v8  ;;  %1178 = vmatprep.mubr.msk.f32.mxu1 %vm1335_vm1, %v1336_v4 }
 0x2d2   :  { %1261 = vmatprep.subr.bf16.mxu1 %v1334_v0 }
 0x2d5   :  { %1263 = vmatpush3.bf16.msra.mxu1 %v1406_v12 }
 0x2d6   :  { %1270 = vmatprep.subr.bf16.mxu1 %v1334_v0 }
 0x3a3   :  { %v348_v39 = vpop.f32.mrb[2].mxu1 }
 0x3a4   :  { %v352_v40 = vadd.f32 %v348_v39, %v137_v38  ;;  %v1158_v41 = vpop.f32.mrb[3].mxu1 }
 0x3a6   :  { %v353_v42 = vmul.f32 %v352_v40, %v1430_v20 }
 0x3a8   :  { %1304 = vtanh.f32 %v353_v42 }
 0x3b2   :  { %v1305_v43 = vpop.eup %1304 }
 0x3b3   :  { %v355_v44 = vmul.f32 %v1305_v43, %v1430_v20 }
 0x3b5   :  { %v356_v45 = vadd.f32 %v355_v44, %v1434_v26  ;;  %v152_v44 = vadd.f32 %v1427_v15, %v1485_v63 }
 0x3b7   :  { %359 = vrot.lane.b32.xlu0 %v356_v45, %s1338_s3  ;;  %v357_v48 = vmul.f32 %v356_v45, %v270_v33 }
 0x429   :  { %v360_v46 = vpop.permute.xlu0 %359 }
 0x42a   :  { %v362_v47 = vmul.f32 %v360_v46, %v356_v45 }
 0x42c   :  { %364 = vrot.lane.b32.xlu1 %v362_v47, %s1339_s13 }
 0x49e   :  { %v365_v49 = vpop.permute.xlu1 %364 }
 0x49f   :  { %v367_v50 = vadd.f32 %v365_v49, %v357_v48 }
 0x4a1   :  { %1306 = vtanh.f32 %v367_v50 }
 0x4ab   :  { %v1307_v57 = vpop.eup %1306 }
 0x4ac   :  { %370 = vrot.lane.b32.xlu0 %v1307_v57, %s1338_s3 }
 0x51e   :  { %v371_v58 = vpop.permute.xlu0 %370 }
 0x51f   :  { %v373_v59 = vmul.f32 %v371_v58, %v356_v45 }
 0x521   :  { %375 = vrot.lane.b32.xlu1 %v373_v59, %s1339_s13 }
 0x593   :  { %v376_v3 = vpop.permute.xlu1 %375 }
 0x594   :  { %1168 = vmatmul.mubr.msk.f32.vlgmr.msra.gmra.mrb[8].mxu0 %vm181_vm5, %v376_v3 }
 0x595   :  { %1266 = vmatpush3.bf16.msra.mxu0 %v1393_v8  ;;  %1189 = vmatprep.mubr.msk.f32.mxu0 %vm1335_vm1, %v1336_v4 }
 0x596   :  { %1267 = vmatprep.subr.bf16.mxu0 %v1334_v0 }
 0x599   :  { %1269 = vmatpush3.bf16.msra.mxu0 %v1406_v12 }
 0x59a   :  { %1276 = vmatprep.subr.bf16.mxu0 %v1334_v0 }
 0x667   :  { %v445_v6 = vpop.f32.mrb[8].mxu0 }
 0x668   :  { %v449_v7 = vadd.f32 %v445_v6, %v142_v5  ;;  %v1169_v9 = vpop.f32.mrb[9].mxu0 }
 0x66a   :  { %v450_v10 = vmul.f32 %v449_v7, %v1430_v20 }
 0x66c   :  { %1308 = vtanh.f32 %v450_v10 }
 0x676   :  { %v1309_v11 = vpop.eup %1308 }
 0x677   :  { %v452_v13 = vmul.f32 %v1309_v11, %v1430_v20 }
 0x679   :  { %v453_v14 = vadd.f32 %v452_v13, %v1434_v26 }
 0x67b   :  { %456 = vrot.lane.b32.xlu0 %v453_v14, %s1338_s3  ;;  %v454_v18 = vmul.f32 %v453_v14, %v367_v50 }
 0x6ed   :  { %v457_v16 = vpop.permute.xlu0 %456 }
 0x6ee   :  { %v459_v17 = vmul.f32 %v457_v16, %v453_v14 }
 0x6f0   :  { %461 = vrot.lane.b32.xlu1 %v459_v17, %s1339_s13 }
 0x762   :  { %v462_v19 = vpop.permute.xlu1 %461 }
 0x763   :  { %v464_v21 = vadd.f32 %v462_v19, %v454_v18  ;;  %v162_v19 = vadd.f32 %v1427_v15, %v1489_v2 }
 0x765   :  { %1310 = vtanh.f32 %v464_v21 }
 0x76f   :  { %v1311_v22 = vpop.eup %1310 }
 0x770   :  { %467 = vrot.lane.b32.xlu0 %v1311_v22, %s1338_s3 }
 0x7e2   :  { %v468_v23 = vpop.permute.xlu0 %467 }
 0x7e3   :  { %v470_v24 = vmul.f32 %v468_v23, %v453_v14 }
 0x7e5   :  { %472 = vrot.lane.b32.xlu1 %v470_v24, %s1339_s13 }
 0x857   :  { %v473_v25 = vpop.permute.xlu1 %472 }
 0x858   :  { %1179 = vmatmul.mubr.msk.f32.vlgmr.msra.gmra.mrb[4].mxu1 %vm181_vm5, %v473_v25 }
 0x859   :  { %1272 = vmatpush3.bf16.msra.mxu1 %v1393_v8  ;;  %1200 = vmatprep.mubr.msk.f32.mxu1 %vm1335_vm1, %v1336_v4 }
 0x85a   :  { %1273 = vmatprep.subr.bf16.mxu1 %v1334_v0 }
 0x85d   :  { %1275 = vmatpush3.bf16.msra.mxu1 %v1406_v12 }
 0x85e   :  { %1282 = vmatprep.subr.bf16.mxu1 %v1334_v0 }
 0x92b   :  { %v542_v28 = vpop.f32.mrb[4].mxu1 }
 0x92c   :  { %v546_v29 = vadd.f32 %v542_v28, %v147_v27  ;;  %v1180_v30 = vpop.f32.mrb[5].mxu1 }
 0x92e   :  { %v547_v31 = vmul.f32 %v546_v29, %v1430_v20 }
 0x930   :  { %1312 = vtanh.f32 %v547_v31 }
 0x93a   :  { %v1313_v32 = vpop.eup %1312 }
 0x93b   :  { %v549_v33 = vmul.f32 %v1313_v32, %v1430_v20 }
 0x93d   :  { %v550_v34 = vadd.f32 %v549_v33, %v1434_v26 }
 0x93f   :  { %553 = vrot.lane.b32.xlu0 %v550_v34, %s1338_s3  ;;  %v551_v37 = vmul.f32 %v550_v34, %v464_v21 }
 0x9b1   :  { %v554_v35 = vpop.permute.xlu0 %553 }
 0x9b2   :  { %v556_v36 = vmul.f32 %v554_v35, %v550_v34 }
 0x9b4   :  { %558 = vrot.lane.b32.xlu1 %v556_v36, %s1339_s13  ;;  %v167_v36 = vadd.f32 %v1487_v1, %v1427_v15  ;;  %v956_v1 = vld [vmem:[%s1599_s4] sm:$0xff] }
 0xa26   :  { %v559_v38 = vpop.permute.xlu1 %558 }
 0xa27   :  { %v561_v39 = vadd.f32 %v559_v38, %v551_v37 }
 0xa29   :  { %1314 = vtanh.f32 %v561_v39 }
 0xa33   :  { %v1315_v40 = vpop.eup %1314 }
 0xa34   :  { %564 = vrot.lane.b32.xlu0 %v1315_v40, %s1338_s3 }
 0xaa6   :  { %v565_v41 = vpop.permute.xlu0 %564 }
 0xaa7   :  { %v567_v42 = vmul.f32 %v565_v41, %v550_v34 }
 0xaa9   :  { %569 = vrot.lane.b32.xlu1 %v567_v42, %s1339_s13 }
 0xb1b   :  { %v570_v43 = vpop.permute.xlu1 %569 }
 0xb1c   :  { %1190 = vmatmul.mubr.msk.f32.vlgmr.msra.gmra.mrb[10].mxu0 %vm181_vm5, %v570_v43 }
 0xb1d   :  { %1278 = vmatpush3.bf16.msra.mxu0 %v1393_v8  ;;  %1211 = vmatprep.mubr.msk.f32.mxu0 %vm1335_vm1, %v1336_v4 }
 0xb1e   :  { %1279 = vmatprep.subr.bf16.mxu0 %v1334_v0 }
 0xb21   :  { %1281 = vmatpush3.bf16.msra.mxu0 %v1406_v12 }
 0xb22   :  { %1288 = vmatprep.subr.bf16.mxu0 %v1334_v0 }
 0xbef   :  { %v639_v45 = vpop.f32.mrb[10].mxu0 }
 0xbf0   :  { %v643_v46 = vadd.f32 %v639_v45, %v152_v44  ;;  %v1191_v47 = vpop.f32.mrb[11].mxu0 }
 0xbf2   :  { %v644_v48 = vmul.f32 %v643_v46, %v1430_v20 }
 0xbf4   :  { %1316 = vtanh.f32 %v644_v48 }
 0xbfe   :  { %v1317_v49 = vpop.eup %1316 }
 0xbff   :  { %v646_v50 = vmul.f32 %v1317_v49, %v1430_v20  ;;  %v959_v49 = vld [vmem:[%s1599_s4 + $0x18] sm:$0xff] }
 0xc01   :  { %v647_v51 = vadd.f32 %v646_v50, %v1434_v26 }
 0xc03   :  { %650 = vrot.lane.b32.xlu0 %v647_v51, %s1338_s3  ;;  %v648_v54 = vmul.f32 %v647_v51, %v561_v39 }
 0xc75   :  { %v651_v52 = vpop.permute.xlu0 %650 }
 0xc76   :  { %v653_v53 = vmul.f32 %v651_v52, %v647_v51 }
 0xc78   :  { %655 = vrot.lane.b32.xlu1 %v653_v53, %s1339_s13 }
 0xcea   :  { %v656_v55 = vpop.permute.xlu1 %655 }
 0xceb   :  { %v658_v56 = vadd.f32 %v656_v55, %v648_v54  ;;  %v1064_v55 = vld [vmem:[%s1600_s5] ss:$0 sm:$0xff] }
 0xced   :  { %1318 = vtanh.f32 %v658_v56 }
 0xcf7   :  { %v1319_v57 = vpop.eup %1318 }
 0xcf8   :  { %661 = vrot.lane.b32.xlu0 %v1319_v57, %s1338_s3 }
 0xd6a   :  { %v662_v58 = vpop.permute.xlu0 %661 }
 0xd6b   :  { %v664_v59 = vmul.f32 %v662_v58, %v647_v51 }
 0xd6d   :  { %666 = vrot.lane.b32.xlu1 %v664_v59, %s1339_s13 }
 0xddf   :  { %v667_v60 = vpop.permute.xlu1 %666 }
 0xde0   :  { %1201 = vmatmul.mubr.msk.f32.vlgmr.msra.gmra.mrb[6].mxu1 %vm181_vm5, %v667_v60 }
 0xde1   :  { %1284 = vmatpush3.bf16.msra.mxu1 %v1393_v8  ;;  %1222 = vmatprep.mubr.msk.f32.mxu1 %vm1335_vm1, %v1336_v4 }
 0xde2   :  { %1285 = vmatprep.subr.bf16.mxu1 %v1334_v0 }
 0xde5   :  { %1287 = vmatpush3.bf16.msra.mxu1 %v1406_v12 }
 0xeb3   :  { %v736_v63 = vpop.f32.mrb[6].mxu1 }
 0xeb4   :  { %v740_v3 = vadd.f32 %v736_v63, %v157_v61  ;;  %v1202_v5 = vpop.f32.mrb[7].mxu1 }
 0xeb6   :  { %v741_v6 = vmul.f32 %v740_v3, %v1430_v20 }
 0xeb8   :  { %1320 = vtanh.f32 %v741_v6 }
 0xec2   :  { %v1321_v7 = vpop.eup %1320 }
 0xec3   :  { %v743_v9 = vmul.f32 %v1321_v7, %v1430_v20 }
 0xec5   :  { %v744_v8 = vadd.f32 %v743_v9, %v1434_v26 }
 0xec7   :  { %747 = vrot.lane.b32.xlu0 %v744_v8, %s1338_s3  ;;  %v745_v12 = vmul.f32 %v744_v8, %v658_v56 }
 0xf39   :  { %v748_v10 = vpop.permute.xlu0 %747 }
 0xf3a   :  { %v750_v11 = vmul.f32 %v748_v10, %v744_v8 }
 0xf3c   :  { %752 = vrot.lane.b32.xlu1 %v750_v11, %s1339_s13 }
 0xfae   :  { %v753_v13 = vpop.permute.xlu1 %752 }
 0xfaf   :  { %v755_v62 = vadd.f32 %v753_v13, %v745_v12 }
 0xfb1   :  { %1322 = vtanh.f32 %v755_v62 }
 0xfbb   :  { %v1323_v14 = vpop.eup %1322 }
 0xfbc   :  { %758 = vrot.lane.b32.xlu0 %v1323_v14, %s1338_s3 }
0x102e   :  { %v759_v16 = vpop.permute.xlu0 %758 }
0x102f   :  { %v761_v17 = vmul.f32 %v759_v16, %v744_v8 }
0x1031   :  { %763 = vrot.lane.b32.xlu1 %v761_v17, %s1339_s13 }
0x10a3   :  { %v764_v18 = vpop.permute.xlu1 %763 }
0x10a4   :  { %1212 = vmatmul.mubr.msk.f32.vlgmr.msra.gmra.mrb[12].mxu0 %vm181_vm5, %v764_v18 }
0x10a5   :  { %1233 = vmatprep.mubr.msk.f32.mxu0 %vm1335_vm1, %v1336_v4 }
0x1177   :  { %v833_v21 = vpop.f32.mrb[12].mxu0 }
0x1178   :  { %v837_v22 = vadd.f32 %v833_v21, %v162_v19  ;;  %v1213_v23 = vpop.f32.mrb[13].mxu0 }
0x117a   :  { %v838_v24 = vmul.f32 %v837_v22, %v1430_v20 }
0x117c   :  { %1324 = vtanh.f32 %v838_v24 }
0x1186   :  { %v1325_v25 = vpop.eup %1324 }
0x1187   :  { %v840_v27 = vmul.f32 %v1325_v25, %v1430_v20 }
0x1189   :  { %v841_v28 = vadd.f32 %v840_v27, %v1434_v26 }
0x118b   :  { %844 = vrot.lane.b32.xlu0 %v841_v28, %s1338_s3  ;;  %v842_v4 = vmul.f32 %v841_v28, %v755_v62 }
0x11fd   :  { %v845_v29 = vpop.permute.xlu0 %844 }
0x11fe   :  { %v847_v30 = vmul.f32 %v845_v29, %v841_v28 }
0x1200   :  { %849 = vrot.lane.b32.xlu1 %v847_v30, %s1339_s13 }
0x1272   :  { %v850_v31 = vpop.permute.xlu1 %849 }
0x1273   :  { %v852_v2 = vadd.f32 %v850_v31, %v842_v4 }
0x1275   :  { %1326 = vtanh.f32 %v852_v2 }
0x127f   :  { %v1327_v32 = vpop.eup %1326 }
0x1280   :  { %855 = vrot.lane.b32.xlu0 %v1327_v32, %s1338_s3 }
0x12f2   :  { %v856_v33 = vpop.permute.xlu0 %855 }
0x12f3   :  { %v858_v34 = vmul.f32 %v856_v33, %v841_v28 }
0x12f5   :  { %860 = vrot.lane.b32.xlu1 %v858_v34, %s1339_s13 }
0x1367   :  { %v861_v35 = vpop.permute.xlu1 %860 }
0x1368   :  { %1223 = vmatmul.mubr.msk.f32.vlgmr.msra.gmra.mrb[8].mxu1 %vm181_vm5, %v861_v35 }
0x143b   :  { %v930_v37 = vpop.f32.mrb[8].mxu1 }
0x143c   :  { %v934_v38 = vadd.f32 %v930_v37, %v167_v36  ;;  %v1224_v39 = vpop.f32.mrb[9].mxu1 }
0x143e   :  { %v935_v40 = vmul.f32 %v934_v38, %v1430_v20 }
0x1440   :  { %1328 = vtanh.f32 %v935_v40 }
0x144a   :  { %v1329_v41 = vpop.eup %1328 }
0x144b   :  { %v937_v42 = vmul.f32 %v1329_v41, %v1430_v20  ;;  %v957_v20 = vld [vmem:[%s1599_s4 + $0x8] sm:$0xff] }
0x144c   :  { %v1289_v48 = vpack.c.bf16 %v957_v20, %v956_v1 }
0x144d   :  { %v938_v43 = vadd.f32 %v937_v42, %v1434_v26  ;;  %v958_v26 = vld [vmem:[%s1599_s4 + $0x10] sm:$0xff] }
0x144e   :  { %1290 = vmatpush3.bf16.msra.mxu0 %v1289_v48  ;;  %v1292_v50 = vpack.c.bf16 %v959_v49, %v958_v26 }
0x144f   :  { %941 = vrot.lane.b32.xlu0 %v938_v43, %s1338_s3  ;;  %v939_v46 = vmul.f32 %v938_v43, %v852_v2  ;;  %1291 = vmatprep.subr.bf16.mxu0 %v1334_v0 }
0x1452   :  { %1293 = vmatpush3.bf16.msra.mxu0 %v1292_v50 }
0x14c1   :  { %v942_v44 = vpop.permute.xlu0 %941 }
0x14c2   :  { %v944_v45 = vmul.f32 %v942_v44, %v938_v43 }
0x14c4   :  { %946 = vrot.lane.b32.xlu1 %v944_v45, %s1339_s13 }
0x1536   :  { %v947_v47 = vpop.permute.xlu1 %946 }
0x1537   :  { %v949_v15 = vadd.f32 %v947_v47, %v939_v46 }
0x1539   :  { %1330 = vtanh.f32 %v949_v15 }
0x1543   :  { %v1331_v51 = vpop.eup %1330 }
0x1544   :  { %952 = vrot.lane.b32.xlu0 %v1331_v51, %s1338_s3 }
0x15b6   :  { %v953_v52 = vpop.permute.xlu0 %952 }
0x15b7   :  { %v955_v53 = vmul.f32 %v953_v52, %v938_v43 }
0x15b9   :  { %968 = vrot.lane.b32.xlu1 %v955_v53, %s1339_s13 }
0x162b   :  { %v969_v54 = vpop.permute.xlu1 %968 }
0x162c   :  { %1234 = vmatmul.mubr.msk.f32.vlgmr.msra.gmra.mrb[14].mxu0 %vm181_vm5, %v969_v54 }
0x16ff   :  { %v1038_v56 = vpop.f32.mrb[14].mxu0 }
0x1700   :  { %v1039_v57 = vadd.f32 %v1064_v55, %v1038_v56  ;;  %v1235_v58 = vpop.f32.mrb[15].mxu0 }
0x1702   :  { %1332 = vtanh.f32 %v1039_v57 }
0x170c   :  { %v1333_v0 = vpop.eup %1332 }
0x170d   :  { %1043 = vst.msk [vmem:[%s1601_s6] sm:$0xff] %vm181_vm5, %v1333_v0 }

</bundles_post_ra>
